<compile_context>
chip_gen: v7x
topology: tpu7x:2x2x1
jax: 0.10.0
libtpu: 0.0.40
codegen_flags: <defaults>
</compile_context>

<pallas_src>
import functools

import jax
import jax.numpy as jnp
from jax.experimental import pallas as pl
from jax.experimental.pallas import tpu as pltpu

IN_DIM = 28 * 28   # 784
H1 = 128           # fc1 out
H2 = 64            # fc2 out
OUT = 10           # logits


def _mlp_kernel(x_ref, w1_ref, b1_ref, w2_ref, b2_ref, w3_ref, b3_ref, o_ref):
    # fc1 + ReLU : (TB, 784) @ (784, 128) -> (TB, 128), f32 accumulate
    h = jnp.dot(x_ref[...], w1_ref[...], preferred_element_type=jnp.float32)
    h = jnp.maximum(h + b1_ref[...], 0.0)
    # fc2 + ReLU : (TB, 128) @ (128, 64) -> (TB, 64)
    h = jnp.dot(h, w2_ref[...], preferred_element_type=jnp.float32)
    h = jnp.maximum(h + b2_ref[...], 0.0)
    # fc3 (logits) : (TB, 64) @ (64, 10) -> (TB, 10)
    h = jnp.dot(h, w3_ref[...], preferred_element_type=jnp.float32)
    o_ref[...] = (h + b3_ref[...]).astype(o_ref.dtype)


def _round_up(n, m):
    return ((n + m - 1) // m) * m


def _pick_tb(batch):
    """Batch-tile rows: small batches -> one tile; large -> >=2 steps, <=1024."""
    b8 = max(8, _round_up(batch, 8))
    if b8 <= 256:
        return b8
    # >= 2 grid steps keeps both v7x TensorCores busy; 1024-row cap keeps the
    # streamed x tile at ~3.6 MiB per buffer (well inside scoped VMEM).
    return min(1024, _round_up((b8 + 1) // 2, 8))


@functools.partial(jax.jit, static_argnames=("tb",))
def net_forward(x_nchw, params, *, tb=None):
    """Forward pass matching PyTorch Net.forward; returns logits (B, 10)."""
    x = x_nchw.reshape(-1, IN_DIM).astype(jnp.float32)
    B = x.shape[0]
    TB = _pick_tb(B) if tb is None else tb
    B_pad = _round_up(max(B, TB), TB)
    if B_pad != B:  # pad rows only when the tile doesn't divide the batch
        x = jnp.pad(x, ((0, B_pad - B), (0, 0)))

    w1 = params["w1"].astype(jnp.float32)                   # (784, 128)
    b1 = params["b1"].astype(jnp.float32).reshape(1, H1)    # (1, 128)
    w2 = params["w2"].astype(jnp.float32)                   # (128, 64)
    b2 = params["b2"].astype(jnp.float32).reshape(1, H2)    # (1, 64)
    w3 = params["w3"].astype(jnp.float32)                   # (64, 10)
    b3 = params["b3"].astype(jnp.float32).reshape(1, OUT)   # (1, 10)

    const = lambda i: (0, 0)  # resident operands: same block every grid step

    out = pl.pallas_call(
        _mlp_kernel,
        out_shape=jax.ShapeDtypeStruct((B_pad, OUT), jnp.float32),
        grid=(B_pad // TB,),
        in_specs=[
            pl.BlockSpec((TB, IN_DIM), lambda i: (i, 0)),   # streamed x tile
            pl.BlockSpec((IN_DIM, H1), const),
            pl.BlockSpec((1, H1), const),
            pl.BlockSpec((H1, H2), const),
            pl.BlockSpec((1, H2), const),
            pl.BlockSpec((H2, OUT), const),
            pl.BlockSpec((1, OUT), const),
        ],
        out_specs=pl.BlockSpec((TB, OUT), lambda i: (i, 0)),
        compiler_params=pltpu.CompilerParams(
            dimension_semantics=("parallel",),
            vmem_limit_bytes=32 * 1024 * 1024,
        ),
    )(x, w1, b1, w2, b2, w3, b3)

    return out[:B] if B_pad != B else out


def init_params(key):
    """Deterministic init mirroring nn.Linear default (U[-1/sqrt(fan_in), +])."""
    def linear_init(k, fan_in, fan_out):
        kw, kb = jax.random.split(k)
        bound = 1.0 / jnp.sqrt(fan_in)
        w = jax.random.uniform(kw, (fan_in, fan_out), jnp.float32, -bound, bound)
        b = jax.random.uniform(kb, (fan_out,), jnp.float32, -bound, bound)
        return w, b

    k1, k2, k3 = jax.random.split(key, 3)
    w1, b1 = linear_init(k1, IN_DIM, H1)
    w2, b2 = linear_init(k2, H1, H2)
    w3, b3 = linear_init(k3, H2, OUT)
    return {"w1": w1, "b1": b1, "w2": w2, "b2": b2, "w3": w3, "b3": b3}


def net_forward_ref(x_nchw, params):
    """Pure-JAX f32 reference (exact PyTorch semantics)."""
    x = x_nchw.reshape(-1, IN_DIM).astype(jnp.float32)
    h = jnp.maximum(jnp.dot(x, params["w1"], precision="highest") + params["b1"], 0.0)
    h = jnp.maximum(jnp.dot(h, params["w2"], precision="highest") + params["b2"], 0.0)
    return jnp.dot(h, params["w3"], precision="highest") + params["b3"]


if __name__ == "__main__":
    key = jax.random.PRNGKey(0)
    kp, kx = jax.random.split(key)
    params = init_params(kp)

    # Small MNIST-like NCHW batch (single tile, grid=(1,)).
    x = jax.random.normal(kx, (8, 1, 28, 28), jnp.float32)
    out = jax.block_until_ready(net_forward(x, params))
    assert out.shape == (8, 10), out.shape
    ref = jax.block_until_ready(net_forward_ref(x, params))
    err = float(jnp.max(jnp.abs(out - ref)))
    assert err < 1e-2, err

    # Multi-step grid + row-padding path (B=200, TB=64 -> 4 steps, 56 pad rows
    # produced and sliced off).
    x2 = jax.random.normal(jax.random.PRNGKey(1), (200, 1, 28, 28), jnp.float32)
    out2 = jax.block_until_ready(net_forward(x2, params, tb=64))
    assert out2.shape == (200, 10), out2.shape
    ref2 = jax.block_until_ready(net_forward_ref(x2, params))
    err2 = float(jnp.max(jnp.abs(out2 - ref2)))
    assert err2 < 1e-2, err2

    print("KERNEL_OK")
</pallas_src>

<mosaic_0001>
module attributes {stable_mosaic.version = 11 : i64} {
  func.func @_mlp_kernel(%arg0: i32, %arg1: memref<8x784xf32, #tpu.memory_space<vmem>>, %arg2: memref<784x128xf32, #tpu.memory_space<vmem>>, %arg3: memref<1x128xf32, #tpu.memory_space<vmem>>, %arg4: memref<128x64xf32, #tpu.memory_space<vmem>>, %arg5: memref<1x64xf32, #tpu.memory_space<vmem>>, %arg6: memref<64x10xf32, #tpu.memory_space<vmem>>, %arg7: memref<1x10xf32, #tpu.memory_space<vmem>>, %arg8: memref<8x10xf32, #tpu.memory_space<vmem>>) attributes {dimension_semantics = [#tpu.dimension_semantics<parallel>], iteration_bounds = array<i64: 1>, scalar_prefetch = 0 : i64, scratch_operands = 0 : i64, tpu.core_type = #tpu.core_type<tc>, window_params = [{transform_indices = @transform_0, window_bounds = array<i64: 8, 784>}, {pipeline_mode = #tpu.pipeline_mode<synchronous>, transform_indices = @transform_1, window_bounds = array<i64: 784, 128>}, {pipeline_mode = #tpu.pipeline_mode<synchronous>, transform_indices = @transform_2, window_bounds = array<i64: 1, 128>}, {pipeline_mode = #tpu.pipeline_mode<synchronous>, transform_indices = @transform_3, window_bounds = array<i64: 128, 64>}, {pipeline_mode = #tpu.pipeline_mode<synchronous>, transform_indices = @transform_4, window_bounds = array<i64: 1, 64>}, {pipeline_mode = #tpu.pipeline_mode<synchronous>, transform_indices = @transform_5, window_bounds = array<i64: 64, 10>}, {pipeline_mode = #tpu.pipeline_mode<synchronous>, transform_indices = @transform_6, window_bounds = array<i64: 1, 10>}, {transform_indices = @transform_7, window_bounds = array<i64: 8, 10>}]} {
    %c0 = arith.constant 0 : index
    %c0_0 = arith.constant 0 : index
    %0 = vector.load %arg1[%c0, %c0_0] : memref<8x784xf32, #tpu.memory_space<vmem>>, vector<8x784xf32>
    %c0_1 = arith.constant 0 : index
    %c0_2 = arith.constant 0 : index
    %1 = vector.load %arg2[%c0_1, %c0_2] : memref<784x128xf32, #tpu.memory_space<vmem>>, vector<784x128xf32>
    %cst = arith.constant dense<0.000000e+00> : vector<8x128xf32>
    %2 = tpu.matmul %0, %1, %cst {dimension_numbers = #tpu.dot_dimension_numbers<[1], [0], [0], [1], [0, 0, 1, 1], [], []>} : vector<8x784xf32>, vector<784x128xf32>, vector<8x128xf32> -> vector<8x128xf32>
    %c0_3 = arith.constant 0 : index
    %c0_4 = arith.constant 0 : index
    %3 = vector.load %arg3[%c0_3, %c0_4] : memref<1x128xf32, #tpu.memory_space<vmem>>, vector<1x128xf32>
    %4 = vector.broadcast %3 : vector<1x128xf32> to vector<8x128xf32>
    %5 = arith.addf %2, %4 : vector<8x128xf32>
    %cst_5 = arith.constant 0.000000e+00 : f32
    %6 = vector.broadcast %cst_5 : f32 to vector<8x128xf32>
    %7 = arith.maximumf %5, %6 : vector<8x128xf32>
    %c0_6 = arith.constant 0 : index
    %c0_7 = arith.constant 0 : index
    %8 = vector.load %arg4[%c0_6, %c0_7] : memref<128x64xf32, #tpu.memory_space<vmem>>, vector<128x64xf32>
    %cst_8 = arith.constant dense<0.000000e+00> : vector<8x64xf32>
    %9 = tpu.matmul %7, %8, %cst_8 {dimension_numbers = #tpu.dot_dimension_numbers<[1], [0], [0], [1], [0, 0, 1, 1], [], []>} : vector<8x128xf32>, vector<128x64xf32>, vector<8x64xf32> -> vector<8x64xf32>
    %c0_9 = arith.constant 0 : index
    %c0_10 = arith.constant 0 : index
    %10 = vector.load %arg5[%c0_9, %c0_10] : memref<1x64xf32, #tpu.memory_space<vmem>>, vector<1x64xf32>
    %11 = vector.broadcast %10 : vector<1x64xf32> to vector<8x64xf32>
    %12 = arith.addf %9, %11 : vector<8x64xf32>
    %cst_11 = arith.constant 0.000000e+00 : f32
    %13 = vector.broadcast %cst_11 : f32 to vector<8x64xf32>
    %14 = arith.maximumf %12, %13 : vector<8x64xf32>
    %c0_12 = arith.constant 0 : index
    %c0_13 = arith.constant 0 : index
    %15 = vector.load %arg6[%c0_12, %c0_13] : memref<64x10xf32, #tpu.memory_space<vmem>>, vector<64x10xf32>
    %cst_14 = arith.constant dense<0.000000e+00> : vector<8x10xf32>
    %16 = tpu.matmul %14, %15, %cst_14 {dimension_numbers = #tpu.dot_dimension_numbers<[1], [0], [0], [1], [0, 0, 1, 1], [], []>} : vector<8x64xf32>, vector<64x10xf32>, vector<8x10xf32> -> vector<8x10xf32>
    %c0_15 = arith.constant 0 : index
    %c0_16 = arith.constant 0 : index
    %17 = vector.load %arg7[%c0_15, %c0_16] : memref<1x10xf32, #tpu.memory_space<vmem>>, vector<1x10xf32>
    %18 = vector.broadcast %17 : vector<1x10xf32> to vector<8x10xf32>
    %19 = arith.addf %16, %18 : vector<8x10xf32>
    %c0_17 = arith.constant 0 : index
    %c0_18 = arith.constant 0 : index
    %20 = vector.load %arg8[%c0_17, %c0_18] : memref<8x10xf32, #tpu.memory_space<vmem>>, vector<8x10xf32>
    tpu.vector_store %arg8[%c0_17, %c0_18], %19 {strides = array<i32>} : memref<8x10xf32, #tpu.memory_space<vmem>>, vector<8x10xf32>,
    return
  }
  func.func @transform_0(%arg0: i32) -> (i32, i32) {
    %c0_i32 = arith.constant 0 : i32
    %c0_i32_0 = arith.constant 0 : i32
    return %arg0, %c0_i32 : i32, i32
  }
  func.func @transform_1(%arg0: i32) -> (i32, i32) {
    %c0_i32 = arith.constant 0 : i32
    %c0_i32_0 = arith.constant 0 : i32
    %c0_i32_1 = arith.constant 0 : i32
    return %c0_i32, %c0_i32_0 : i32, i32
  }
  func.func @transform_2(%arg0: i32) -> (i32, i32) {
    %c0_i32 = arith.constant 0 : i32
    %c0_i32_0 = arith.constant 0 : i32
    %c0_i32_1 = arith.constant 0 : i32
    return %c0_i32, %c0_i32_0 : i32, i32
  }
  func.func @transform_3(%arg0: i32) -> (i32, i32) {
    %c0_i32 = arith.constant 0 : i32
    %c0_i32_0 = arith.constant 0 : i32
    %c0_i32_1 = arith.constant 0 : i32
    return %c0_i32, %c0_i32_0 : i32, i32
  }
  func.func @transform_4(%arg0: i32) -> (i32, i32) {
    %c0_i32 = arith.constant 0 : i32
    %c0_i32_0 = arith.constant 0 : i32
    %c0_i32_1 = arith.constant 0 : i32
    return %c0_i32, %c0_i32_0 : i32, i32
  }
  func.func @transform_5(%arg0: i32) -> (i32, i32) {
    %c0_i32 = arith.constant 0 : i32
    %c0_i32_0 = arith.constant 0 : i32
    %c0_i32_1 = arith.constant 0 : i32
    return %c0_i32, %c0_i32_0 : i32, i32
  }
  func.func @transform_6(%arg0: i32) -> (i32, i32) {
    %c0_i32 = arith.constant 0 : i32
    %c0_i32_0 = arith.constant 0 : i32
    %c0_i32_1 = arith.constant 0 : i32
    return %c0_i32, %c0_i32_0 : i32, i32
  }
  func.func @transform_7(%arg0: i32) -> (i32, i32) {
    %c0_i32 = arith.constant 0 : i32
    %c0_i32_0 = arith.constant 0 : i32
    return %arg0, %c0_i32 : i32, i32
  }
}

</mosaic_0001>

<bundles_post_ra>
// kernel: net_forward.1
= control target key start
LH: loop header
LB: loop body
LE: loop exit
PB: predicated region body
PF: predicated region fallthrough
CT: control target
= control target key end

     0   :  { %s1454_s0 = inlined_call_operand.vmem [shape: f32[8,784], index: 0, kind: input, shape index: {}]   ;;  %s1455_s1 = inlined_call_operand.vmem [shape: f32[784,128], index: 1, kind: input, shape index: {}]   ;;  %s1456_s2 = inlined_call_operand.vmem [shape: f32[1,128], index: 2, kind: input, shape index: {}]   ;;  %s1457_s3 = inlined_call_operand.vmem [shape: f32[128,64], index: 3, kind: input, shape index: {}]   ;;  %s1458_s4 = inlined_call_operand.vmem [shape: f32[1,64], index: 4, kind: input, shape index: {}]   ;;  %s1459_s5 = inlined_call_operand.vmem [shape: f32[64,10], index: 5, kind: input, shape index: {}]   ;;  %s1460_s6 = inlined_call_operand.vmem [shape: f32[1,10], index: 6, kind: input, shape index: {}]   ;;  %s1461_s7 = inlined_call_operand.hbm [shape: f32[8,10], index: 7, kind: output, shape index: {}]  }
   0x1   :  { %v50_v0 = vld [vmem:[%s1455_s1 + $0x80] sm:$0xff]  ;;  %v51_v1 = vld [vmem:[%s1455_s1 + $0x88] sm:$0xff]  ;;  %v52_v11 = vld [vmem:[%s1455_s1 + $0x90] sm:$0xff] }
   0x2   :  { %v34_v2 = vld [vmem:[%s1455_s1] sm:$0xff]  ;;  %v823_v3 = vpack.c.bf16 %v51_v1, %v50_v0  ;;  %v35_v4 = vld [vmem:[%s1455_s1 + $0x8] sm:$0xff]  ;;  %v53_v13 = vld [vmem:[%s1455_s1 + $0x98] sm:$0xff] }
   0x3   :  { %v82_v5 = vld [vmem:[%s1455_s1 + $0x180] sm:$0xff]  ;;  %v83_v6 = vld [vmem:[%s1455_s1 + $0x188] sm:$0xff]  ;;  %v825_v7 = vpack.c.bf16 %v35_v4, %v34_v2  ;;  %v36_v14 = vld [vmem:[%s1455_s1 + $0x10] sm:$0xff]  ;;  %v827_v16 = vpack.c.bf16 %v53_v13, %v52_v11 }
   0x4   :  { %v855_v8 = vpack.c.bf16 %v83_v6, %v82_v5  ;;  %v66_v9 = vld [vmem:[%s1455_s1 + $0x100] sm:$0xff]  ;;  %v67_v10 = vld [vmem:[%s1455_s1 + $0x108] sm:$0xff]  ;;  %824 = vmatprep.subr.bf16.mxu0 %v823_v3  ;;  %v37_v15 = vld [vmem:[%s1455_s1 + $0x18] sm:$0xff] }
   0x5   :  { %v857_v12 = vpack.c.bf16 %v67_v10, %v66_v9  ;;  %826 = vmatpush3.bf16.msra.mxu0 %v825_v7  ;;  %v829_v17 = vpack.c.bf16 %v37_v15, %v36_v14  ;;  %v84_v18 = vld [vmem:[%s1455_s1 + $0x190] sm:$0xff]  ;;  %v85_v19 = vld [vmem:[%s1455_s1 + $0x198] sm:$0xff]  ;;  %v54_v23 = vld [vmem:[%s1455_s1 + $0xa0] sm:$0xff] }
   0x6   :  { %856 = vmatprep.subr.bf16.mxu1 %v855_v8  ;;  %v68_v20 = vld [vmem:[%s1455_s1 + $0x110] sm:$0xff]  ;;  %v859_v21 = vpack.c.bf16 %v85_v19, %v84_v18  ;;  %v69_v22 = vld [vmem:[%s1455_s1 + $0x118] sm:$0xff]  ;;  %v55_v24 = vld [vmem:[%s1455_s1 + $0xa8] sm:$0xff]  ;;  %828 = vmatprep.subr.bf16.mxu0 %v827_v16 }
   0x7   :  { %858 = vmatpush3.bf16.msra.mxu1 %v857_v12  ;;  %v861_v25 = vpack.c.bf16 %v69_v22, %v68_v20  ;;  %v831_v26 = vpack.c.bf16 %v55_v24, %v54_v23  ;;  %v38_v27 = vld [vmem:[%s1455_s1 + $0x20] sm:$0xff]  ;;  %v39_v28 = vld [vmem:[%s1455_s1 + $0x28] sm:$0xff]  ;;  %v56_v35 = vld [vmem:[%s1455_s1 + $0xb0] sm:$0xff] }
   0x8   :  { %v86_v29 = vld [vmem:[%s1455_s1 + $0x1a0] sm:$0xff]  ;;  %860 = vmatprep.subr.bf16.mxu1 %v859_v21  ;;  %v87_v30 = vld [vmem:[%s1455_s1 + $0x1a8] sm:$0xff]  ;;  %v833_v33 = vpack.c.bf16 %v39_v28, %v38_v27  ;;  %v57_v36 = vld [vmem:[%s1455_s1 + $0xb8] sm:$0xff] }
   0x9   :  { %v70_v31 = vld [vmem:[%s1455_s1 + $0x120] sm:$0xff]  ;;  %v71_v32 = vld [vmem:[%s1455_s1 + $0x128] sm:$0xff]  ;;  %830 = vmatpush3.bf16.msra.mxu0 %v829_v17  ;;  %v863_v34 = vpack.c.bf16 %v87_v30, %v86_v29  ;;  %v40_v37 = vld [vmem:[%s1455_s1 + $0x30] sm:$0xff]  ;;  %v835_v39 = vpack.c.bf16 %v57_v36, %v56_v35 }
   0xa   :  { %832 = vmatprep.subr.bf16.mxu0 %v831_v26  ;;  %v865_v38 = vpack.c.bf16 %v71_v32, %v70_v31  ;;  %v41_v40 = vld [vmem:[%s1455_s1 + $0x38] sm:$0xff]  ;;  %v88_v41 = vld [vmem:[%s1455_s1 + $0x1b0] sm:$0xff]  ;;  %v58_v46 = vld [vmem:[%s1455_s1 + $0xc0] sm:$0xff] }
   0xb   :  { %862 = vmatpush3.bf16.msra.mxu1 %v861_v25  ;;  %v89_v42 = vld [vmem:[%s1455_s1 + $0x1b8] sm:$0xff]  ;;  %v72_v44 = vld [vmem:[%s1455_s1 + $0x130] sm:$0xff]  ;;  %v59_v47 = vld [vmem:[%s1455_s1 + $0xc8] sm:$0xff]  ;;  %v837_v48 = vpack.c.bf16 %v41_v40, %v40_v37 }
   0xc   :  { %864 = vmatprep.subr.bf16.mxu1 %v863_v34  ;;  %v867_v43 = vpack.c.bf16 %v89_v42, %v88_v41  ;;  %v73_v45 = vld [vmem:[%s1455_s1 + $0x138] sm:$0xff]  ;;  %v90_v49 = vld [vmem:[%s1455_s1 + $0x1c0] sm:$0xff]  ;;  %v91_v50 = vld [vmem:[%s1455_s1 + $0x1c8] sm:$0xff]  ;;  %v839_v52 = vpack.c.bf16 %v59_v47, %v58_v46 }
   0xd   :  { %834 = vmatpush3.bf16.msra.mxu0 %v833_v33  ;;  %v869_v51 = vpack.c.bf16 %v73_v45, %v72_v44  ;;  %v42_v53 = vld [vmem:[%s1455_s1 + $0x40] sm:$0xff]  ;;  %v43_v54 = vld [vmem:[%s1455_s1 + $0x48] sm:$0xff]  ;;  %v871_v56 = vpack.c.bf16 %v91_v50, %v90_v49  ;;  %v60_v58 = vld [vmem:[%s1455_s1 + $0xd0] sm:$0xff]  ;;  %v986_v50 = vmov 0.0|0.0  }
   0xe   :  { %836 = vmatprep.subr.bf16.mxu0 %v835_v39  ;;  %v74_v55 = vld [vmem:[%s1455_s1 + $0x140] sm:$0xff]  ;;  %v75_v57 = vld [vmem:[%s1455_s1 + $0x148] sm:$0xff]  ;;  %v61_v59 = vld [vmem:[%s1455_s1 + $0xd8] sm:$0xff]  ;;  %v841_v62 = vpack.c.bf16 %v43_v54, %v42_v53 }
   0xf   :  { %866 = vmatpush3.bf16.msra.mxu1 %v865_v38  ;;  %v92_v60 = vld [vmem:[%s1455_s1 + $0x1d0] sm:$0xff]  ;;  %v93_v61 = vld [vmem:[%s1455_s1 + $0x1d8] sm:$0xff]  ;;  %v873_v63 = vpack.c.bf16 %v75_v57, %v74_v55  ;;  %v843_v0 = vpack.c.bf16 %v61_v59, %v60_v58  ;;  %v62_v6 = vld [vmem:[%s1455_s1 + $0xe0] sm:$0xff] }
  0x10   :  { %868 = vmatprep.subr.bf16.mxu1 %v867_v43  ;;  %v44_v1 = vld [vmem:[%s1455_s1 + $0x50] sm:$0xff]  ;;  %v45_v2 = vld [vmem:[%s1455_s1 + $0x58] sm:$0xff]  ;;  %v875_v4 = vpack.c.bf16 %v93_v61, %v92_v60  ;;  %v63_v7 = vld [vmem:[%s1455_s1 + $0xe8] sm:$0xff] }
  0x11   :  { %838 = vmatpush3.bf16.msra.mxu0 %v837_v48  ;;  %v76_v3 = vld [vmem:[%s1455_s1 + $0x150] sm:$0xff]  ;;  %v77_v5 = vld [vmem:[%s1455_s1 + $0x158] sm:$0xff]  ;;  %v94_v8 = vld [vmem:[%s1455_s1 + $0x1e0] sm:$0xff]  ;;  %v845_v10 = vpack.c.bf16 %v45_v2, %v44_v1  ;;  %v847_v14 = vpack.c.bf16 %v63_v7, %v62_v6 }
  0x12   :  { %840 = vmatprep.subr.bf16.mxu0 %v839_v52  ;;  %v95_v9 = vld [vmem:[%s1455_s1 + $0x1e8] sm:$0xff]  ;;  %v46_v11 = vld [vmem:[%s1455_s1 + $0x60] sm:$0xff]  ;;  %v877_v13 = vpack.c.bf16 %v77_v5, %v76_v3  ;;  %v64_v19 = vld [vmem:[%s1455_s1 + $0xf0] sm:$0xff] }
  0x13   :  { %870 = vmatpush3.bf16.msra.mxu1 %v869_v51  ;;  %v28_v12 = vld [vmem:[%s1454_s0 + $0x8] sm:$0xff]  ;;  %v78_v16 = vld [vmem:[%s1455_s1 + $0x160] sm:$0xff]  ;;  %v879_v18 = vpack.c.bf16 %v95_v9, %v94_v8  ;;  %v65_v20 = vld [vmem:[%s1455_s1 + $0xf8] sm:$0xff] }
  0x14   :  { %872 = vmatprep.subr.bf16.mxu1 %v871_v56  ;;  %v47_v15 = vld [vmem:[%s1455_s1 + $0x68] sm:$0xff]  ;;  %207 = vmatprep.mubr.f32.mxu0 %v28_v12  ;;  %v30_v21 = vld [vmem:[%s1454_s0 + $0x18] sm:$0xff]  ;;  %v96_v22 = vld [vmem:[%s1455_s1 + $0x1f0] sm:$0xff]  ;;  %v851_v26 = vpack.c.bf16 %v65_v20, %v64_v19 }
  0x15   :  { %842 = vmatpush3.bf16.msra.mxu0 %v841_v62  ;;  %v79_v17 = vld [vmem:[%s1455_s1 + $0x168] sm:$0xff]  ;;  %v97_v23 = vld [vmem:[%s1455_s1 + $0x1f8] sm:$0xff]  ;;  %277 = vmatprep.mubr.f32.mxu1 %v30_v21  ;;  %v849_v24 = vpack.c.bf16 %v47_v15, %v46_v11  ;;  %v48_v27 = vld [vmem:[%s1455_s1 + $0x70] sm:$0xff] }
  0x16   :  { %844 = vmatprep.subr.bf16.mxu0 %v843_v0  ;;  %v881_v25 = vpack.c.bf16 %v79_v17, %v78_v16  ;;  %v49_v28 = vld [vmem:[%s1455_s1 + $0x78] sm:$0xff]  ;;  %v80_v29 = vld [vmem:[%s1455_s1 + $0x170] sm:$0xff]  ;;  %v883_v30 = vpack.c.bf16 %v97_v23, %v96_v22  ;;  %v114_v32 = vld [vmem:[%s1455_s1 + $0x280] sm:$0xff] }
  0x17   :  { %874 = vmatpush3.bf16.msra.mxu1 %v873_v63  ;;  %v81_v31 = vld [vmem:[%s1455_s1 + $0x178] sm:$0xff]  ;;  %v115_v33 = vld [vmem:[%s1455_s1 + $0x288] sm:$0xff]  ;;  %v853_v34 = vpack.c.bf16 %v49_v28, %v48_v27  ;;  %v98_v37 = vld [vmem:[%s1455_s1 + $0x200] sm:$0xff] }
  0x18   :  { %876 = vmatprep.subr.bf16.mxu1 %v875_v4  ;;  %v885_v35 = vpack.c.bf16 %v81_v31, %v80_v29  ;;  %v887_v36 = vpack.c.bf16 %v115_v33, %v114_v32  ;;  %v99_v38 = vld [vmem:[%s1455_s1 + $0x208] sm:$0xff]  ;;  %v116_v39 = vld [vmem:[%s1455_s1 + $0x290] sm:$0xff]  ;;  %v117_v40 = vld [vmem:[%s1455_s1 + $0x298] sm:$0xff] }
  0x19   :  { %846 = vmatpush3.bf16.msra.mxu0 %v845_v10  ;;  %v27_v41 = vld [vmem:[%s1454_s0] sm:$0xff]  ;;  %v889_v42 = vpack.c.bf16 %v99_v38, %v98_v37  ;;  %v29_v43 = vld [vmem:[%s1454_s0 + $0x10] sm:$0xff]  ;;  %v891_v45 = vpack.c.bf16 %v117_v40, %v116_v39  ;;  %v101_v46 = vld [vmem:[%s1455_s1 + $0x218] sm:$0xff] }
  0x1a   :  { %848 = vmatprep.subr.bf16.mxu0 %v847_v14  ;;  %v100_v44 = vld [vmem:[%s1455_s1 + $0x210] sm:$0xff]  ;;  %v118_v47 = vld [vmem:[%s1455_s1 + $0x2a0] sm:$0xff]  ;;  %v119_v48 = vld [vmem:[%s1455_s1 + $0x2a8] sm:$0xff] }
  0x1b   :  { %878 = vmatpush3.bf16.msra.mxu1 %v877_v13  ;;  %v32_v49 = vld [vmem:[%s1454_s0 + $0x28] sm:$0xff]  ;;  %v130_v51 = vld [vmem:[%s1455_s1 + $0x300] sm:$0xff] }
  0x1c   :  { %880 = vmatprep.subr.bf16.mxu1 %v879_v18  ;;  %v131_v52 = vld [vmem:[%s1455_s1 + $0x308] sm:$0xff] }
  0x1d   :  { %850 = vmatpush3.bf16.msra.mxu0 %v849_v24  ;;  %v920_v53 = vpack.c.bf16 %v131_v52, %v130_v51 }
  0x1e   :  { %852 = vmatprep.subr.bf16.mxu0 %v851_v26 }
  0x1f   :  { %882 = vmatpush3.bf16.msra.mxu1 %v881_v25 }
  0x20   :  { %884 = vmatprep.subr.bf16.mxu1 %v883_v30 }
  0x21   :  { %854 = vmatpush3.bf16.msra.mxu0 %v853_v34 }
  0x22   :  { %888 = vmatprep.subr.bf16.mxu0 %v887_v36 }
  0x23   :  { %886 = vmatpush3.bf16.msra.mxu1 %v885_v35 }
  0x24   :  { %919 = vmatprep.subr.bf16.mxu1 %v986_v50  ;;  %208 = vmatmul.mubr.f32.vlgmr.msra.gmra.mrb[0].mxu0 %v27_v41 }
  0x25   :  { %12 = vsyncpa [#allocation3], 0  ;;  %890 = vmatpush3.bf16.msra.mxu0 %v889_v42  ;;  %v893_v54 = vpack.c.bf16 %v101_v46, %v100_v44  ;;  %v895_v55 = vpack.c.bf16 %v119_v48, %v118_v47  ;;  %v102_v56 = vld [vmem:[%s1455_s1 + $0x220] sm:$0xff]  ;;  %v103_v57 = vld [vmem:[%s1455_s1 + $0x228] sm:$0xff]  ;;  %347 = vmatprep.mubr.f32.mxu0 %v32_v49  ;;  %vm987_vm0 = vmmov 0   ;;  %v988_v60 = vmov 0.0  }
  0x26   :  { %278 = vmatmul.mubr.f32.vlgmr.msra.gmra.mrb[0].mxu1 %v29_v43  ;;  %892 = vmatprep.subr.bf16.mxu0 %v891_v45  ;;  %v120_v58 = vld [vmem:[%s1455_s1 + $0x2b0] sm:$0xff]  ;;  %v121_v59 = vld [vmem:[%s1455_s1 + $0x2b8] sm:$0xff]  ;;  %vm139_vm1 = vcmask 130048   ;;  %v897_v62 = vpack.c.bf16 %v103_v57, %v102_v56  ;;  %v122_v2 = vld [vmem:[%s1455_s1 + $0x2c0] sm:$0xff]  ;;  %vm533_vm2 = vcmask 523264   ;;  %s989_s29 = smov [#allocation2]  }
  0x27   :  { %921 = vmatpush3.bf16.msra.mxu1 %v920_v53  ;;  %766 = vmatprep.mubr.msk.f32.mxu1 %vm987_vm0, %v988_v60  ;;  %v33_v61 = vld [vmem:[%s1454_s0 + $0x30] sm:$0xff]  ;;  %v899_v63 = vpack.c.bf16 %v121_v59, %v120_v58  ;;  %v105_v1 = vld [vmem:[%s1455_s1 + $0x238] sm:$0xff]  ;;  %v123_v3 = vld [vmem:[%s1455_s1 + $0x2c8] sm:$0xff]  ;;  %s615_s30 = sshll.u32 %s989_s29, 4  ;;  %vm607_vm3 = vcmask 80896   ;;  %s616_s30 = int_to_ptr.vmem [resolvable:$true] %s615_s30 }
  0x28   :  { %922 = vmatprep.subr.bf16.mxu1 %v986_v50  ;;  %v104_v0 = vld [vmem:[%s1455_s1 + $0x230] sm:$0xff]  ;;  %v903_v5 = vpack.c.bf16 %v123_v3, %v122_v2  ;;  %v106_v6 = vld [vmem:[%s1455_s1 + $0x240] sm:$0xff]  ;;  %v107_v7 = vld [vmem:[%s1455_s1 + $0x248] sm:$0xff]  ;;  %p967_p1 = scmp.lt.s32.totalorder %s616_s30, %s616_s30 }
  0x29   :  { %894 = vmatpush3.bf16.msra.mxu0 %v893_v54  ;;  %v901_v4 = vpack.c.bf16 %v105_v1, %v104_v0  ;;  %v124_v8 = vld [vmem:[%s1455_s1 + $0x2d0] sm:$0xff]  ;;  %v125_v9 = vld [vmem:[%s1455_s1 + $0x2d8] sm:$0xff]  ;;  %v905_v10 = vpack.c.bf16 %v107_v7, %v106_v6  ;;  %v126_v14 = vld [vmem:[%s1455_s1 + $0x2e0] sm:$0xff] }
  0x2a   :  { %896 = vmatprep.subr.bf16.mxu0 %v895_v55  ;;  %767 = vmatmul.mubr.msk.f32.vlgmr.msra.gmra.mrb[2].mxu1 %vm139_vm1, %v33_v61  ;;  %v907_v11 = vpack.c.bf16 %v125_v9, %v124_v8  ;;  %v108_v12 = vld [vmem:[%s1455_s1 + $0x250] sm:$0xff]  ;;  %v109_v13 = vld [vmem:[%s1455_s1 + $0x258] sm:$0xff]  ;;  %v127_v15 = vld [vmem:[%s1455_s1 + $0x2e8] sm:$0xff] }
  0x2b   :  { %801 = vmatprep.mubr.msk.f32.mxu1 %vm987_vm0, %v988_v60  ;;  %v909_v16 = vpack.c.bf16 %v109_v13, %v108_v12  ;;  %v911_v17 = vpack.c.bf16 %v127_v15, %v126_v14  ;;  %v110_v18 = vld [vmem:[%s1455_s1 + $0x260] sm:$0xff]  ;;  %v111_v19 = vld [vmem:[%s1455_s1 + $0x268] sm:$0xff]  ;;  %v128_v20 = vld [vmem:[%s1455_s1 + $0x2f0] sm:$0xff] }
  0x2c   :  { %v129_v21 = vld [vmem:[%s1455_s1 + $0x2f8] sm:$0xff]  ;;  %v913_v22 = vpack.c.bf16 %v111_v19, %v110_v18  ;;  %v112_v24 = vld [vmem:[%s1455_s1 + $0x270] sm:$0xff]  ;;  %v31_v27 = vld [vmem:[%s1454_s0 + $0x20] sm:$0xff] }
  0x2d   :  { %898 = vmatpush3.bf16.msra.mxu0 %v897_v62  ;;  %v915_v23 = vpack.c.bf16 %v129_v21, %v128_v20  ;;  %v113_v25 = vld [vmem:[%s1455_s1 + $0x278] sm:$0xff]  ;;  %v424_v28 = vld [vmem:[%s1457_s3] sm:$0xff]  ;;  %v425_v29 = vld [vmem:[%s1457_s3 + $0x8] sm:$0xff] }
  0x2e   :  { %900 = vmatprep.subr.bf16.mxu0 %v899_v63  ;;  %v917_v26 = vpack.c.bf16 %v113_v25, %v112_v24  ;;  %v426_v30 = vld [vmem:[%s1457_s3 + $0x10] sm:$0xff]  ;;  %v923_v31 = vpack.c.bf16 %v425_v29, %v424_v28  ;;  %v427_v32 = vld [vmem:[%s1457_s3 + $0x18] sm:$0xff]  ;;  %v428_v34 = vld [vmem:[%s1457_s3 + $0x20] sm:$0xff] }
  0x2f   :  { %v926_v33 = vpack.c.bf16 %v427_v32, %v426_v30  ;;  %v429_v35 = vld [vmem:[%s1457_s3 + $0x28] sm:$0xff]  ;;  %v430_v37 = vld [vmem:[%s1457_s3 + $0x30] sm:$0xff]  ;;  %v431_v38 = vld [vmem:[%s1457_s3 + $0x38] sm:$0xff] }
  0x30   :  { %924 = vmatpush3.bf16.msra.mxu1 %v923_v31  ;;  %v929_v36 = vpack.c.bf16 %v429_v35, %v428_v34  ;;  %v932_v39 = vpack.c.bf16 %v431_v38, %v430_v37  ;;  %v432_v40 = vld [vmem:[%s1457_s3 + $0x40] sm:$0xff]  ;;  %v433_v41 = vld [vmem:[%s1457_s3 + $0x48] sm:$0xff]  ;;  %v434_v43 = vld [vmem:[%s1457_s3 + $0x50] sm:$0xff] }
  0x31   :  { %902 = vmatpush3.bf16.msra.mxu0 %v901_v4  ;;  %925 = vmatprep.subr.bf16.mxu1 %v986_v50  ;;  %v935_v42 = vpack.c.bf16 %v433_v41, %v432_v40  ;;  %v435_v44 = vld [vmem:[%s1457_s3 + $0x58] sm:$0xff]  ;;  %v436_v46 = vld [vmem:[%s1457_s3 + $0x60] sm:$0xff]  ;;  %v437_v47 = vld [vmem:[%s1457_s3 + $0x68] sm:$0xff] }
  0x32   :  { %904 = vmatprep.subr.bf16.mxu0 %v903_v5  ;;  %v938_v45 = vpack.c.bf16 %v435_v44, %v434_v43  ;;  %v941_v48 = vpack.c.bf16 %v437_v47, %v436_v46  ;;  %v438_v49 = vld [vmem:[%s1457_s3 + $0x70] sm:$0xff]  ;;  %v439_v51 = vld [vmem:[%s1457_s3 + $0x78] sm:$0xff]  ;;  %v518_v53 = vld [vmem:[%s1459_s5] sm:$0xff] }
  0x33   :  { %v944_v52 = vpack.c.bf16 %v439_v51, %v438_v49  ;;  %v519_v54 = vld [vmem:[%s1459_s5 + $0x8] sm:$0xff]  ;;  %v520_v55 = vld [vmem:[%s1459_s5 + $0x10] sm:$0xff]  ;;  %v521_v57 = vld [vmem:[%s1459_s5 + $0x18] sm:$0xff] }
  0x34   :  { %927 = vmatpush3.bf16.msra.mxu1 %v926_v33  ;;  %v947_v56 = vpack.c.bf16 %v519_v54, %v518_v53  ;;  %v950_v58 = vpack.c.bf16 %v521_v57, %v520_v55  ;;  %v522_v59 = vld [vmem:[%s1459_s5 + $0x20] sm:$0xff]  ;;  %v524_v14 = vld [vmem:[%s1459_s5 + $0x30] sm:$0xff]  ;;  %v525_v15 = vld [vmem:[%s1459_s5 + $0x38] sm:$0xff] }
  0x35   :  { %906 = vmatpush3.bf16.msra.mxu0 %v905_v10  ;;  %928 = vmatprep.subr.bf16.mxu1 %v986_v50  ;;  %v623_v63 = vld [vmem:[%s1456_s2] ss:$0 sm:$0xff] }
  0x36   :  { %908 = vmatprep.subr.bf16.mxu0 %v907_v11 }
  0x38   :  { %930 = vmatpush3.bf16.msra.mxu1 %v929_v36 }
  0x39   :  { %910 = vmatpush3.bf16.msra.mxu0 %v909_v16  ;;  %931 = vmatprep.subr.bf16.mxu1 %v986_v50  ;;  %v956_v16 = vpack.c.bf16 %v525_v15, %v524_v14 }
  0x3a   :  { %912 = vmatprep.subr.bf16.mxu0 %v911_v17  ;;  %v625_v17 = vld [vmem:[%s1458_s4] ss:$0 sm:$0xff] }
  0x3c   :  { %933 = vmatpush3.bf16.msra.mxu1 %v932_v39 }
  0x3d   :  { %914 = vmatpush3.bf16.msra.mxu0 %v913_v22  ;;  %934 = vmatprep.subr.bf16.mxu1 %v986_v50  ;;  %v626_v22 = vld [vmem:[%s1460_s6] ss:$0 sm:$0xff] }
  0x3e   :  { %916 = vmatprep.subr.bf16.mxu0 %v915_v23 }
  0x40   :  { %936 = vmatpush3.bf16.msra.mxu1 %v935_v42 }
  0x41   :  { %918 = vmatpush3.bf16.msra.mxu0 %v917_v26  ;;  %937 = vmatprep.subr.bf16.mxu1 %v986_v50 }
  0x42   :  { %946 = vmatprep.subr.bf16.mxu0 %v986_v50 }
  0x44   :  { %348 = vmatmul.mubr.f32.vlgmr.msra.gmra.mrb[2].mxu0 %v31_v27  ;;  %939 = vmatpush3.bf16.msra.mxu1 %v938_v45 }
  0x45   :  { %820 = vmatprep.mubr.msk.f32.mxu0 %vm987_vm0, %v988_v60  ;;  %940 = vmatprep.subr.bf16.mxu1 %v986_v50  ;;  %v523_v60 = vld [vmem:[%s1459_s5 + $0x28] sm:$0xff]  ;;  %s962_s5 = scalar_lea.vmem %s616_s30, 128 }
  0x46   :  { %948 = vmatpush3.bf16.msra.mxu0 %v947_v56  ;;  %v953_v61 = vpack.c.bf16 %v523_v60, %v522_v59  ;;  %p963_p0 = scmp.ne.s32.totalorder %s616_s30, %s962_s5  ;;  %p968_p2 = scmp.lt.s32.totalorder %s962_s5, %s962_s5 }
  0x47   :  { %949 = vmatprep.subr.bf16.mxu0 %v986_v50 }
  0x48   :  { %942 = vmatpush3.bf16.msra.mxu1 %v941_v48  ;;  %p969_p3 = por %p968_p2, %p967_p1 }
  0x49   :  { %943 = vmatprep.subr.bf16.mxu1 %v986_v50 }
  0x4a   :  { %951 = vmatpush3.bf16.msra.mxu0 %v950_v58  ;;  %p970_p4 = pnand %p969_p3, %p963_p0 }
  0x4b   :  { %952 = vmatprep.subr.bf16.mxu0 %v986_v50 }
  0x4c   :  { %945 = vmatpush3.bf16.msra.mxu1 %v944_v52 }
  0x4e   :  { %954 = vmatpush3.bf16.msra.mxu0 %v953_v61 }
  0x4f   :  { %955 = vmatprep.subr.bf16.mxu0 %v986_v50 }
  0x52   :  { %957 = vmatpush3.bf16.msra.mxu0 %v956_v16 }
  0xf7   :  { %v660_v62 = vpop.f32.mrb[0].mxu0 }
  0xf8   :  { %v661_v0 = vpop.f32.mrb[1].mxu0 }
  0xf9   :  { %v695_v1 = vpop.f32.mrb[0].mxu1  ;;  %v662_v2 = vadd.f32 %v661_v0, %v660_v62 }
  0xfa   :  { %v696_v3 = vpop.f32.mrb[1].mxu1 }
  0xfb   :  { %v697_v4 = vadd.f32 %v696_v3, %v695_v1  ;;  %v210_v5 = vadd.f32 %v662_v2, %v623_v63 }
  0xfd   :  { %v280_v6 = vadd.f32 %v697_v4, %v210_v5  ;;  %v419_v7 = vpop.f32.mrb[2].mxu1 }
  0xfe   :  { %v768_v8 = vpop.f32.mrb[3].mxu1 }
 0x117   :  { %v730_v9 = vpop.f32.mrb[2].mxu0 }
 0x118   :  { %v731_v10 = vpop.f32.mrb[3].mxu0 }
 0x119   :  { %v732_v11 = vadd.f32 %v731_v10, %v730_v9 }
 0x11b   :  { %v350_v12 = vadd.f32 %v732_v11, %v280_v6 }
 0x11d   :  { %v420_v13 = vadd.f32 %v419_v7, %v350_v12 }
 0x11f   :  { %v423_v50 = vmax.f32 %v420_v13, 0.0 }
 0x121   :  { %802 = vmatmul.mubr.f32.vlgmr.msra.gmra.mrb[4].mxu1 %v423_v50 }
 0x1f4   :  { %v513_v18 = vpop.f32.mrb[4].mxu1 }
 0x1f5   :  { %v514_v19 = vadd.f32 %v625_v17, %v513_v18  ;;  %v803_v20 = vpop.f32.mrb[5].mxu1 }
 0x1f7   :  { %v517_v21 = vmax.f32 %v514_v19, 0.0 }
 0x1f9   :  { %821 = vmatmul.mubr.msk.f32.vlgmr.msra.gmra.mrb[4].mxu0 %vm533_vm2, %v517_v21 }
 0x2cc   :  { %v603_v23 = vpop.f32.mrb[4].mxu0 }
 0x2cd   :  { %v604_v24 = vadd.f32 %v626_v22, %v603_v23  ;;  %v822_v25 = vpop.f32.mrb[5].mxu0 }
 0x2cf   :  { %608 = vst.msk [vmem:[#allocation2] sm:$0xff] %vm607_vm3, %v604_v24 }
 0x2d0   :  { %973 = shalt.err (!%p970_p4)
}
 0x2d1   :  { %s974_s8 = scalar_lea.hbm %s1461_s7, 128 }
 0x2d2   :  { %p975_p5 = scmp.ne.s32.totalorder %s1461_s7, %s974_s8  ;;  %p978_p6 = scmp.lt.u32.totalorder %s974_s8, %s1461_s7 }
 0x2d4   :  { %p980_p7 = pnand %p978_p6, %p975_p5 }
 0x2d6   :  { %983 = shalt.err (!%p980_p7)
}
 0x2d7   :  { %618 = dma.vmem_to_hbm [thread:$0]  %s616_s30, 128, %s1461_s7, [#allocation3]  }
 0x2d8   :  { %984 = dma.done.wait [#allocation3], 128  }
 0x2d9   :  { %985 = vsyncadd [#allocation3], 4294967168 }
 0x2da   :  { %622 = vsyncpa [#allocation3], 1 }

</bundles_post_ra>
